<compile_context>
chip_gen: v7x
topology: tpu7x:2x2x1
jax: 0.10.0
libtpu: 0.0.40
codegen_flags: <defaults>
</compile_context>

<pallas_src>
import functools

import jax
import jax.numpy as jnp
from jax.experimental import pallas as pl
from jax.experimental.pallas import tpu as pltpu

_LANE = 128


def _discriminator_kernel(x_ref, w1t_ref, b1_ref, w2t_ref, b2_ref, o_ref):
    # x_ref:   (TB, NIN)      activations (f32 or bf16)
    # w1t_ref: (NIN, NIN)     bf16 (fc1 weight, transposed)
    # b1_ref:  (1, NIN)       f32
    # w2t_ref: (NIN, NOUT_P)  bf16 (fc2 weight, transposed, zero-padded lanes)
    # b2_ref:  (1, NOUT_P)    f32 (zero-padded)
    # o_ref:   (TB, NOUT_P)   f32 (lane-dense store)
    x = x_ref[...].astype(jnp.bfloat16)                       # no-op if x is bf16
    h = jnp.dot(x, w1t_ref[...], preferred_element_type=jnp.float32)
    h = jnp.maximum(h + b1_ref[...], 0.0)                     # bias + ReLU in f32
    y = jnp.dot(h.astype(jnp.bfloat16), w2t_ref[...],
                preferred_element_type=jnp.float32)
    o_ref[...] = y + b2_ref[...]


def _round_up(x, m):
    return ((x + m - 1) // m) * m


def _pick_tb(B, x_dtype):
    """Batch-tile size.

    B <= 128: one full-extent block (single grid step).
    Otherwise: sublane-aligned tile, capped at 2048 rows, with >= 2 grid steps
    so dimension_semantics=('parallel',) can shard across both v7x cores.
    Partial last blocks are handled by the ceil-div grid (Pallas masks them).
    """
    itemsize = jnp.dtype(x_dtype).itemsize
    align = {1: 32, 2: 16}.get(itemsize, 8)   # rows per packed sublane tile
    if B <= 128:
        return B
    return min(2048, _round_up(pl.cdiv(B, 2), align))


@functools.lru_cache(maxsize=None)
def _build_forward(B, nin, nout, nout_p, tb, x_dtype_name):
    x_dtype = jnp.dtype(x_dtype_name)
    grid = pl.cdiv(B, tb)

    # VMEM budget for this tiling (x / out tiles double-buffered, weights
    # resident, bf16); leave headroom under v7x's 64 MiB per-TC physical VMEM.
    x_bytes = 2 * tb * nin * x_dtype.itemsize
    o_bytes = 2 * tb * nout_p * 4
    w_bytes = 2 * 2 * (nin * nin + nin * nout_p)   # bf16 weights
    b_bytes = 2 * 4 * (nin + nout_p)               # f32 biases
    vmem_limit = int(min(48 << 20,
                         max(16 << 20,
                             2 * (x_bytes + o_bytes + w_bytes + b_bytes))))

    const = lambda i: (0, 0)

    call = pl.pallas_call(
        _discriminator_kernel,
        out_shape=jax.ShapeDtypeStruct((B, nout_p), jnp.float32),
        grid_spec=pltpu.PrefetchScalarGridSpec(
            num_scalar_prefetch=0,
            grid=(grid,),
            in_specs=[
                pl.BlockSpec((tb, nin), lambda i: (i, 0)),       # x tile (pipelined)
                pl.BlockSpec((nin, nin), const),                 # W1^T (resident)
                pl.BlockSpec((1, nin), const),                   # b1
                pl.BlockSpec((nin, nout_p), const),              # W2^T (lane-padded)
                pl.BlockSpec((1, nout_p), const),                # b2
            ],
            out_specs=pl.BlockSpec((tb, nout_p), lambda i: (i, 0)),
        ),
        compiler_params=pltpu.CompilerParams(
            dimension_semantics=("parallel",),
            vmem_limit_bytes=vmem_limit,
        ),
    )

    def forward(x, w1t, b1, w2t, b2):
        out = call(x, w1t, b1, w2t, b2)
        # Padded lanes are exact zeros; the slice lives inside the same jit so
        # it is a single fused dispatch with the kernel (no eager second pass).
        return out[:, :nout]

    return jax.jit(forward)


def prepare_discriminator_params(w1, b1, w2, b2):
    """One-time prep: transpose weights, cast to bf16, lane-pad fc2 outputs.

    w1: (nin, nin)  PyTorch layout (out, in)
    b1: (nin,)
    w2: (nout, nin) PyTorch layout (out, in)
    b2: (nout,)
    """
    nin = w1.shape[1]
    nout = w2.shape[0]
    nout_p = _round_up(nout, _LANE)

    w1t = jnp.transpose(w1).astype(jnp.bfloat16)                       # (nin, nin)
    w2t = jnp.zeros((nin, nout_p), jnp.bfloat16).at[:, :nout].set(
        jnp.transpose(w2).astype(jnp.bfloat16))                        # (nin, nout_p)
    b1r = b1.reshape(1, nin).astype(jnp.float32)
    b2r = jnp.zeros((1, nout_p), jnp.float32).at[0, :nout].set(
        b2.astype(jnp.float32))
    return dict(w1t=w1t, b1=b1r, w2t=w2t, b2=b2r,
                nin=nin, nout=nout, nout_p=nout_p)


def discriminator_forward(x, params, *, tb=None):
    """Pallas TPU forward of Discriminator.

    x:      (B, nin) activations (f32 or bf16; bf16 avoids an in-kernel cast
            and halves the dominant HBM read term).
    params: output of prepare_discriminator_params().
    Returns (B, nout) f32 logits.
    """
    B, nin = x.shape
    if nin != params["nin"]:
        raise ValueError(f"expected nin={params['nin']}, got {nin}")
    if tb is None:
        tb = _pick_tb(B, x.dtype)
    tb = int(tb)
    fwd = _build_forward(B, params["nin"], params["nout"], params["nout_p"],
                         tb, jnp.dtype(x.dtype).name)
    return fwd(x, params["w1t"], params["b1"], params["w2t"], params["b2"])


def _init_linear(key, out_features, in_features, dtype=jnp.float32):
    """Deterministic init mimicking nn.Linear default (uniform +- 1/sqrt(fan_in))."""
    kw, kb = jax.random.split(key)
    bound = 1.0 / (in_features ** 0.5)
    w = jax.random.uniform(kw, (out_features, in_features), dtype,
                           minval=-bound, maxval=bound)
    b = jax.random.uniform(kb, (out_features,), dtype,
                           minval=-bound, maxval=bound)
    return w, b


def _reference(x, w1, b1, w2, b2):
    return jnp.maximum(x @ w1.T + b1, 0.0) @ w2.T + b2


if __name__ == "__main__":
    NIN, NOUT = 256, 2

    root = jax.random.PRNGKey(0)
    kx, k1, k2, kx2 = jax.random.split(root, 4)

    w1, b1 = _init_linear(k1, NIN, NIN)
    w2, b2 = _init_linear(k2, NOUT, NIN)
    params = prepare_discriminator_params(w1, b1, w2, b2)

    # Small batch: single full-extent block.
    x_small = jax.random.normal(kx, (8, NIN), jnp.float32)
    y_small = jax.block_until_ready(discriminator_forward(x_small, params))
    ref_small = _reference(x_small, w1, b1, w2, b2)
    assert y_small.shape == (8, NOUT)
    # bf16 MXU inputs (f32 accumulate) => loosened tolerance vs f32 reference.
    assert jnp.allclose(y_small, ref_small, atol=5e-2, rtol=5e-2), \
        "mismatch vs reference (small batch)"

    # Awkward batch size: exercises the ceil-div grid + masked partial block
    # (tb=152, 2 parallel grid steps, last block 148 real rows).
    x_big = jax.random.normal(kx2, (300, NIN), jnp.float32)
    y_big = jax.block_until_ready(discriminator_forward(x_big, params))
    ref_big = _reference(x_big, w1, b1, w2, b2)
    assert y_big.shape == (300, NOUT)
    assert jnp.allclose(y_big, ref_big, atol=5e-2, rtol=5e-2), \
        "mismatch vs reference (partial-block batch)"

    print("KERNEL_OK")
</pallas_src>

<mosaic_0001>
module attributes {stable_mosaic.version = 11 : i64} {
  func.func @_discriminator_kernel(%arg0: i32, %arg1: memref<8x256xf32, #tpu.memory_space<vmem>>, %arg2: memref<256x256xbf16, #tpu.memory_space<vmem>>, %arg3: memref<1x256xf32, #tpu.memory_space<vmem>>, %arg4: memref<256x128xbf16, #tpu.memory_space<vmem>>, %arg5: memref<1x128xf32, #tpu.memory_space<vmem>>, %arg6: memref<8x128xf32, #tpu.memory_space<vmem>>) attributes {dimension_semantics = [#tpu.dimension_semantics<parallel>], iteration_bounds = array<i64: 1>, scalar_prefetch = 0 : i64, scratch_operands = 0 : i64, tpu.core_type = #tpu.core_type<tc>, window_params = [{transform_indices = @transform_0, window_bounds = array<i64: 8, 256>}, {pipeline_mode = #tpu.pipeline_mode<synchronous>, transform_indices = @transform_1, window_bounds = array<i64: 256, 256>}, {pipeline_mode = #tpu.pipeline_mode<synchronous>, transform_indices = @transform_2, window_bounds = array<i64: 1, 256>}, {pipeline_mode = #tpu.pipeline_mode<synchronous>, transform_indices = @transform_3, window_bounds = array<i64: 256, 128>}, {pipeline_mode = #tpu.pipeline_mode<synchronous>, transform_indices = @transform_4, window_bounds = array<i64: 1, 128>}, {transform_indices = @transform_5, window_bounds = array<i64: 8, 128>}]} {
    %c0 = arith.constant 0 : index
    %c0_0 = arith.constant 0 : index
    %0 = vector.load %arg1[%c0, %c0_0] : memref<8x256xf32, #tpu.memory_space<vmem>>, vector<8x256xf32>
    %1 = arith.truncf %0 : vector<8x256xf32> to vector<8x256xbf16>
    %c0_1 = arith.constant 0 : index
    %c0_2 = arith.constant 0 : index
    %2 = vector.load %arg2[%c0_1, %c0_2] : memref<256x256xbf16, #tpu.memory_space<vmem>>, vector<256x256xbf16>
    %cst = arith.constant dense<0.000000e+00> : vector<8x256xf32>
    %3 = tpu.matmul %1, %2, %cst {dimension_numbers = #tpu.dot_dimension_numbers<[1], [0], [0], [1], [0, 0, 1, 1], [], []>} : vector<8x256xbf16>, vector<256x256xbf16>, vector<8x256xf32> -> vector<8x256xf32>
    %c0_3 = arith.constant 0 : index
    %c0_4 = arith.constant 0 : index
    %4 = vector.load %arg3[%c0_3, %c0_4] : memref<1x256xf32, #tpu.memory_space<vmem>>, vector<1x256xf32>
    %5 = vector.broadcast %4 : vector<1x256xf32> to vector<8x256xf32>
    %6 = arith.addf %3, %5 : vector<8x256xf32>
    %cst_5 = arith.constant 0.000000e+00 : f32
    %7 = vector.broadcast %cst_5 : f32 to vector<8x256xf32>
    %8 = arith.maximumf %6, %7 : vector<8x256xf32>
    %9 = arith.truncf %8 : vector<8x256xf32> to vector<8x256xbf16>
    %c0_6 = arith.constant 0 : index
    %c0_7 = arith.constant 0 : index
    %10 = vector.load %arg4[%c0_6, %c0_7] : memref<256x128xbf16, #tpu.memory_space<vmem>>, vector<256x128xbf16>
    %cst_8 = arith.constant dense<0.000000e+00> : vector<8x128xf32>
    %11 = tpu.matmul %9, %10, %cst_8 {dimension_numbers = #tpu.dot_dimension_numbers<[1], [0], [0], [1], [0, 0, 1, 1], [], []>} : vector<8x256xbf16>, vector<256x128xbf16>, vector<8x128xf32> -> vector<8x128xf32>
    %c0_9 = arith.constant 0 : index
    %c0_10 = arith.constant 0 : index
    %12 = vector.load %arg5[%c0_9, %c0_10] : memref<1x128xf32, #tpu.memory_space<vmem>>, vector<1x128xf32>
    %13 = vector.broadcast %12 : vector<1x128xf32> to vector<8x128xf32>
    %14 = arith.addf %11, %13 : vector<8x128xf32>
    %c0_11 = arith.constant 0 : index
    %c0_12 = arith.constant 0 : index
    %15 = vector.load %arg6[%c0_11, %c0_12] : memref<8x128xf32, #tpu.memory_space<vmem>>, vector<8x128xf32>
    tpu.vector_store %arg6[%c0_11, %c0_12], %14 {strides = array<i32>} : memref<8x128xf32, #tpu.memory_space<vmem>>, vector<8x128xf32>,
    return
  }
  func.func @transform_0(%arg0: i32) -> (i32, i32) {
    %c0_i32 = arith.constant 0 : i32
    %c0_i32_0 = arith.constant 0 : i32
    return %arg0, %c0_i32 : i32, i32
  }
  func.func @transform_1(%arg0: i32) -> (i32, i32) {
    %c0_i32 = arith.constant 0 : i32
    %c0_i32_0 = arith.constant 0 : i32
    %c0_i32_1 = arith.constant 0 : i32
    return %c0_i32, %c0_i32_0 : i32, i32
  }
  func.func @transform_2(%arg0: i32) -> (i32, i32) {
    %c0_i32 = arith.constant 0 : i32
    %c0_i32_0 = arith.constant 0 : i32
    %c0_i32_1 = arith.constant 0 : i32
    return %c0_i32, %c0_i32_0 : i32, i32
  }
  func.func @transform_3(%arg0: i32) -> (i32, i32) {
    %c0_i32 = arith.constant 0 : i32
    %c0_i32_0 = arith.constant 0 : i32
    %c0_i32_1 = arith.constant 0 : i32
    return %c0_i32, %c0_i32_0 : i32, i32
  }
  func.func @transform_4(%arg0: i32) -> (i32, i32) {
    %c0_i32 = arith.constant 0 : i32
    %c0_i32_0 = arith.constant 0 : i32
    %c0_i32_1 = arith.constant 0 : i32
    return %c0_i32, %c0_i32_0 : i32, i32
  }
  func.func @transform_5(%arg0: i32) -> (i32, i32) {
    %c0_i32 = arith.constant 0 : i32
    %c0_i32_0 = arith.constant 0 : i32
    return %arg0, %c0_i32 : i32, i32
  }
}

</mosaic_0001>

<bundles_post_ra>
// kernel: forward.1
= control target key start
LH: loop header
LB: loop body
LE: loop exit
PB: predicated region body
PF: predicated region fallthrough
CT: control target
= control target key end

     0   :  { %10 = vsyncpa [#allocation3], 0  ;;  %s789_s0 = inlined_call_operand.hbm [shape: f32[8,256], index: 0, kind: input, shape index: {}]   ;;  %s790_s1 = inlined_call_operand.hbm [shape: bf16[256,256], index: 1, kind: input, shape index: {}]   ;;  %s791_s2 = inlined_call_operand.vmem [shape: f32[1,256], index: 2, kind: input, shape index: {}]   ;;  %s792_s3 = inlined_call_operand.hbm [shape: bf16[256,128], index: 3, kind: input, shape index: {}]   ;;  %s793_s4 = inlined_call_operand.vmem [shape: f32[1,128], index: 4, kind: input, shape index: {}]   ;;  %s794_s5 = inlined_call_operand.vmem [shape: f32[8,128], index: 5, kind: output, shape index: {}]  }
   0x1   :  { %11 = vsyncpa [#allocation5], 0  ;;  %s707_s18 = smov [#allocation4]   ;;  %s637_s22 = scalar_lea.hbm %s790_s1, 4096 }
   0x2   :  { %s27_s19 = sshll.u32 %s707_s18, 4  ;;  %p638_p0 = scmp.ne.s32.totalorder %s790_s1, %s637_s22  ;;  %s28_s19 = int_to_ptr.vmem [resolvable:$true] %s27_s19 }
   0x3   :  { %p641_p1 = scmp.lt.u32.totalorder %s637_s22, %s790_s1 }
   0x5   :  { %p643_p2 = pnand %p641_p1, %p638_p0 }
   0x7   :  { %646 = shalt.err (!%p643_p2)
}
   0x8   :  { %s647_s27 = scalar_lea.vmem %s28_s19, 4096  ;;  %p652_p4 = scmp.lt.s32.totalorder %s28_s19, %s28_s19 }
   0x9   :  { %p648_p3 = scmp.ne.s32.totalorder %s28_s19, %s647_s27  ;;  %p653_p5 = scmp.lt.s32.totalorder %s647_s27, %s647_s27 }
   0xb   :  { %p654_p6 = por %p653_p5, %p652_p4 }
   0xd   :  { %p655_p7 = pnand %p654_p6, %p648_p3 }
   0xf   :  { %658 = shalt.err (!%p655_p7)
}
  0x10   :  { %s708_s28 = smov 128   ;;  %s709_s29 = smov 8  }
  0x11   :  { %33 = dma.hbm_to_vmem [thread:$0]  %s790_s1, 4096, %s28_s19, [#allocation5], %s708_s28, %s708_s28, %s709_s29  }
  0x12   :  { %s710_s7 = smov [#allocation2]   ;;  %s711_s9 = smov [#allocation6]  }
  0x13   :  { %s18_s8 = sshll.u32 %s710_s7, 4  ;;  %s41_s10 = sshll.u32 %s711_s9, 4  ;;  %s19_s8 = int_to_ptr.vmem [resolvable:$true] %s18_s8  ;;  %s42_s10 = int_to_ptr.vmem [resolvable:$true] %s41_s10 }
  0x14   :  { %s659_s13 = scalar_lea.hbm %s789_s0, 256 }
  0x15   :  { %p660_p8 = scmp.ne.s32.totalorder %s789_s0, %s659_s13  ;;  %p663_p9 = scmp.lt.u32.totalorder %s659_s13, %s789_s0 }
  0x17   :  { %p665_p10 = pnand %p663_p9, %p660_p8 }
  0x19   :  { %668 = shalt.err (!%p665_p10)
}
  0x1a   :  { %s669_s1 = scalar_lea.vmem %s19_s8, 256  ;;  %p674_p12 = scmp.lt.s32.totalorder %s19_s8, %s19_s8 }
  0x1b   :  { %p670_p11 = scmp.ne.s32.totalorder %s19_s8, %s669_s1  ;;  %p675_p13 = scmp.lt.s32.totalorder %s669_s1, %s669_s1 }
  0x1d   :  { %p676_p0 = por %p675_p13, %p674_p12 }
  0x1f   :  { %p677_p1 = pnand %p676_p0, %p670_p11 }
  0x21   :  { %680 = shalt.err (!%p677_p1)
}
  0x22   :  { %21 = dma.hbm_to_vmem [thread:$0]  %s789_s0, 256, %s19_s8, [#allocation3]  }
  0x23   :  { %s681_s22 = scalar_lea.hbm %s792_s3, 2048 }
  0x24   :  { %p682_p2 = scmp.ne.s32.totalorder %s792_s3, %s681_s22  ;;  %p685_p3 = scmp.lt.u32.totalorder %s681_s22, %s792_s3 }
  0x26   :  { %p687_p4 = pnand %p685_p3, %p682_p2 }
  0x28   :  { %690 = shalt.err (!%p687_p4)
}
  0x29   :  { %s691_s27 = scalar_lea.vmem %s42_s10, 2048  ;;  %p696_p6 = scmp.lt.s32.totalorder %s42_s10, %s42_s10 }
  0x2a   :  { %p692_p5 = scmp.ne.s32.totalorder %s42_s10, %s691_s27  ;;  %p697_p7 = scmp.lt.s32.totalorder %s691_s27, %s691_s27 }
  0x2c   :  { %p698_p8 = por %p697_p7, %p696_p6 }
  0x2e   :  { %p699_p9 = pnand %p698_p8, %p692_p5 }
  0x30   :  { %702 = shalt.err (!%p699_p9)
}
  0x31   :  { %s712_s0 = smov 64   ;;  %s713_s28 = smov 4  }
  0x32   :  { %47 = dma.hbm_to_vmem [thread:$0]  %s792_s3, 2048, %s42_s10, [#allocation5], %s712_s0, %s712_s0, %s713_s28  }
  0x33   :  { %703 = dma.done.wait [#allocation3], 256  }
  0x34   :  { %704 = vsyncadd [#allocation3], 4294967040 }
  0x35   :  { %705 = dma.done.wait [#allocation5], 6144  }
  0x36   :  { %706 = vsyncadd [#allocation5], 4294961152  ;;  %v573_v0 = vld [vmem:[#allocation4 + $0x4] ss:$8 sps:$4 sm:$0xff]   ;;  %v575_v1 = vld [vmem:[#allocation4] ss:$8 sps:$4 sm:$0xff]   ;;  %v98_v52 = vlaneseq }
  0x37   :  { %268 = vmatprep.subr.bf16.mxu0 %v573_v0  ;;  %v576_v2 = vld [vmem:[#allocation4 + $0x14] ss:$8 sps:$4 sm:$0xff]   ;;  %v578_v3 = vld [vmem:[#allocation4 + $0x10] ss:$8 sps:$4 sm:$0xff]   ;;  %v579_v4 = vld [vmem:[#allocation4 + $0x24] ss:$8 sps:$4 sm:$0xff]  }
  0x38   :  { %269 = vmatpush1.bf16.msra.mxu0 %v575_v1  ;;  %v581_v5 = vld [vmem:[#allocation4 + $0x20] ss:$8 sps:$4 sm:$0xff]   ;;  %v582_v6 = vld [vmem:[#allocation4 + $0x34] ss:$8 sps:$4 sm:$0xff]   ;;  %v584_v7 = vld [vmem:[#allocation4 + $0x30] ss:$8 sps:$4 sm:$0xff]  }
  0x39   :  { %270 = vmatprep.subr.bf16.mxu0 %v576_v2  ;;  %v585_v8 = vld [vmem:[#allocation4 + $0x44] ss:$8 sps:$4 sm:$0xff]   ;;  %v587_v9 = vld [vmem:[#allocation4 + $0x40] ss:$8 sps:$4 sm:$0xff]   ;;  %v588_v10 = vld [vmem:[#allocation4 + $0x54] ss:$8 sps:$4 sm:$0xff]  }
  0x3a   :  { %v590_v11 = vld [vmem:[#allocation4 + $0x50] ss:$8 sps:$4 sm:$0xff]   ;;  %v591_v12 = vld [vmem:[#allocation4 + $0x64] ss:$8 sps:$4 sm:$0xff]   ;;  %v593_v13 = vld [vmem:[#allocation4 + $0x60] ss:$8 sps:$4 sm:$0xff]  }
  0x3b   :  { %v61_v14 = vld [vmem:[#allocation2 + $0x8] sm:$0xff]  ;;  %v621_v17 = vld [vmem:[#allocation6 + $0x40] sm:$0xff]   ;;  %v623_v19 = vld [vmem:[#allocation6 + $0x48] sm:$0xff]   ;;  %v99_v53 = vshrl.u32 %v98_v52, 7 }
  0x3c   :  { %271 = vmatpush1.bf16.msra.mxu0 %v578_v3  ;;  %v594_v15 = vld [vmem:[#allocation4 + $0x74] ss:$8 sps:$4 sm:$0xff]   ;;  %v63_v16 = vpack.c.bf16 %v61_v14, %v61_v14  ;;  %v622_v18 = vld [vmem:[#allocation6] sm:$0xff]   ;;  %v596_v20 = vld [vmem:[#allocation4 + $0x70] ss:$8 sps:$4 sm:$0xff]   ;;  %544 = vmatprep.subr.bf16.mxu1 %v621_v17 }
  0x3d   :  { %272 = vmatprep.subr.bf16.mxu0 %v579_v4  ;;  %545 = vmatpush3.bf16.msra.mxu1 %v622_v18  ;;  %v624_v21 = vld [vmem:[#allocation6 + $0x8] sm:$0xff]   ;;  %v625_v22 = vld [vmem:[#allocation6 + $0x50] sm:$0xff]   ;;  %v627_v26 = vld [vmem:[#allocation6 + $0x58] sm:$0xff]   ;;  %v100_v54 = vsub.s32 0, %v99_v53  ;;  %v104_v56 = vsub.s32 1, %v99_v53 }
  0x3e   :  { %300 = vmatprep.mubr.bf16.mxu0 %v63_v16  ;;  %546 = vmatprep.subr.bf16.mxu1 %v623_v19  ;;  %v597_v23 = vld [vmem:[#allocation4 + $0x84] ss:$8 sps:$4 sm:$0xff]   ;;  %v599_v24 = vld [vmem:[#allocation4 + $0x80] ss:$8 sps:$4 sm:$0xff]   ;;  %v626_v25 = vld [vmem:[#allocation6 + $0x10] sm:$0xff]  }
  0x3f   :  { %v600_v27 = vld [vmem:[#allocation4 + $0x94] ss:$8 sps:$4 sm:$0xff]   ;;  %v602_v28 = vld [vmem:[#allocation4 + $0x90] ss:$8 sps:$4 sm:$0xff]   ;;  %v603_v30 = vld [vmem:[#allocation4 + $0xa4] ss:$8 sps:$4 sm:$0xff]  }
  0x40   :  { %273 = vmatpush1.bf16.msra.mxu0 %v581_v5  ;;  %v628_v29 = vld [vmem:[#allocation6 + $0x18] sm:$0xff]   ;;  %v629_v31 = vld [vmem:[#allocation6 + $0x60] sm:$0xff]   ;;  %v631_v34 = vld [vmem:[#allocation6 + $0x68] sm:$0xff]  }
  0x41   :  { %274 = vmatprep.subr.bf16.mxu0 %v582_v6  ;;  %547 = vmatpush3.bf16.msra.mxu1 %v624_v21  ;;  %v630_v32 = vld [vmem:[#allocation6 + $0x20] sm:$0xff]   ;;  %v606_v35 = vld [vmem:[#allocation4 + $0xb4] ss:$8 sps:$4 sm:$0xff]   ;;  %v632_v36 = vld [vmem:[#allocation6 + $0x28] sm:$0xff]  }
  0x42   :  { %548 = vmatprep.subr.bf16.mxu1 %v625_v22  ;;  %v605_v33 = vld [vmem:[#allocation4 + $0xa0] ss:$8 sps:$4 sm:$0xff]   ;;  %v608_v37 = vld [vmem:[#allocation4 + $0xb0] ss:$8 sps:$4 sm:$0xff]   ;;  %v609_v38 = vld [vmem:[#allocation4 + $0xc4] ss:$8 sps:$4 sm:$0xff]  }
  0x43   :  { %v611_v39 = vld [vmem:[#allocation4 + $0xc0] ss:$8 sps:$4 sm:$0xff]   ;;  %v612_v40 = vld [vmem:[#allocation4 + $0xd4] ss:$8 sps:$4 sm:$0xff]   ;;  %v614_v41 = vld [vmem:[#allocation4 + $0xd0] ss:$8 sps:$4 sm:$0xff]  }
  0x44   :  { %275 = vmatpush1.bf16.msra.mxu0 %v584_v7  ;;  %v615_v42 = vld [vmem:[#allocation4 + $0xe4] ss:$8 sps:$4 sm:$0xff]   ;;  %v617_v43 = vld [vmem:[#allocation4 + $0xe0] ss:$8 sps:$4 sm:$0xff]   ;;  %v618_v44 = vld [vmem:[#allocation4 + $0xf4] ss:$8 sps:$4 sm:$0xff]  }
  0x45   :  { %276 = vmatprep.subr.bf16.mxu0 %v585_v8  ;;  %549 = vmatpush3.bf16.msra.mxu1 %v626_v25  ;;  %v620_v45 = vld [vmem:[#allocation4 + $0xf0] ss:$8 sps:$4 sm:$0xff]  }
  0x46   :  { %550 = vmatprep.subr.bf16.mxu1 %v627_v26  ;;  %v60_v46 = vld [vmem:[#allocation2] sm:$0xff]  ;;  %v635_v50 = vld [vmem:[#allocation6 + $0x78] sm:$0xff]  }
  0x47   :  { %v62_v47 = vpack.c.bf16 %v60_v46, %v60_v46  ;;  %v633_v48 = vld [vmem:[#allocation6 + $0x70] sm:$0xff]   ;;  %v636_v51 = vld [vmem:[#allocation6 + $0x38] sm:$0xff]  }
  0x48   :  { %277 = vmatpush1.bf16.msra.mxu0 %v587_v9  ;;  %v634_v49 = vld [vmem:[#allocation6 + $0x30] sm:$0xff]  }
  0x49   :  { %278 = vmatprep.subr.bf16.mxu0 %v588_v10  ;;  %551 = vmatpush3.bf16.msra.mxu1 %v628_v29  ;;  %v96_v55 = vld [vmem:[%s791_s2] sm:$0x3] }
  0x4a   :  { %552 = vmatprep.subr.bf16.mxu1 %v629_v31  ;;  %v101_v57 = vrot.slane %v96_v55, %v100_v54  ;;  %v105_v58 = vrot.slane %v96_v55, %v104_v56  ;;  %v527_v6 = vld [vmem:[%s793_s4] ss:$0 sm:$0xff] }
  0x4c   :  { %279 = vmatpush1.bf16.msra.mxu0 %v590_v11 }
  0x4d   :  { %280 = vmatprep.subr.bf16.mxu0 %v591_v12  ;;  %553 = vmatpush3.bf16.msra.mxu1 %v630_v32 }
  0x4e   :  { %554 = vmatprep.subr.bf16.mxu1 %v631_v34 }
  0x50   :  { %281 = vmatpush1.bf16.msra.mxu0 %v593_v13 }
  0x51   :  { %282 = vmatprep.subr.bf16.mxu0 %v594_v15  ;;  %555 = vmatpush3.bf16.msra.mxu1 %v632_v36 }
  0x52   :  { %556 = vmatprep.subr.bf16.mxu1 %v633_v48 }
  0x54   :  { %283 = vmatpush1.bf16.msra.mxu0 %v596_v20 }
  0x55   :  { %284 = vmatprep.subr.bf16.mxu0 %v597_v23  ;;  %557 = vmatpush3.bf16.msra.mxu1 %v634_v49 }
  0x56   :  { %558 = vmatprep.subr.bf16.mxu1 %v635_v50 }
  0x58   :  { %285 = vmatpush1.bf16.msra.mxu0 %v599_v24 }
  0x59   :  { %286 = vmatprep.subr.bf16.mxu0 %v600_v27  ;;  %559 = vmatpush3.bf16.msra.mxu1 %v636_v51 }
  0x5c   :  { %287 = vmatpush1.bf16.msra.mxu0 %v602_v28 }
  0x5d   :  { %288 = vmatprep.subr.bf16.mxu0 %v603_v30 }
  0x60   :  { %289 = vmatpush1.bf16.msra.mxu0 %v605_v33 }
  0x61   :  { %290 = vmatprep.subr.bf16.mxu0 %v606_v35 }
  0x64   :  { %291 = vmatpush1.bf16.msra.mxu0 %v608_v37 }
  0x65   :  { %292 = vmatprep.subr.bf16.mxu0 %v609_v38 }
  0x68   :  { %293 = vmatpush1.bf16.msra.mxu0 %v611_v39 }
  0x69   :  { %294 = vmatprep.subr.bf16.mxu0 %v612_v40 }
  0x6c   :  { %295 = vmatpush1.bf16.msra.mxu0 %v614_v41 }
  0x6d   :  { %296 = vmatprep.subr.bf16.mxu0 %v615_v42 }
  0x70   :  { %297 = vmatpush1.bf16.msra.mxu0 %v617_v43 }
  0x71   :  { %298 = vmatprep.subr.bf16.mxu0 %v618_v44 }
  0x74   :  { %299 = vmatpush1.bf16.msra.mxu0 %v620_v45 }
  0x77   :  { %301 = vmatmul.mubr.bf16.vlgmr.msra.gmra.mrb[0].mxu0 %v62_v47 }
 0x14a   :  { %v302_v59 = vpop.f32.mrb[0].mxu0 }
 0x14b   :  { %v303_v60 = vadd.f32 %v302_v59, %v101_v57  ;;  %v304_v61 = vpop.f32.mrb[1].mxu0 }
 0x14c   :  { %v305_v62 = vadd.f32 %v304_v61, %v105_v58  ;;  %v306_v63 = vpop.f32.mrb[2].mxu0 }
 0x14d   :  { %v309_v0 = vmax.f32 %v303_v60, 0.0  ;;  %v307_v1 = vpop.f32.mrb[3].mxu0 }
 0x14e   :  { %v310_v2 = vmax.f32 %v305_v62, 0.0 }
 0x14f   :  { %v311_v4 = vpack.c.bf16 %v309_v0, %v309_v0 }
 0x150   :  { %v312_v3 = vpack.c.bf16 %v310_v2, %v310_v2 }
 0x152   :  { %480 = vmatprep.mubr.bf16.mxu1 %v312_v3 }
 0x153   :  { %481 = vmatmul.mubr.bf16.vlgmr.msra.gmra.mrb[0].mxu1 %v311_v4 }
 0x226   :  { %v560_v5 = vpop.f32.mrb[0].mxu1 }
 0x227   :  { %v561_v7 = vpop.f32.mrb[1].mxu1 }
 0x228   :  { %v562_v8 = vadd.f32 %v561_v7, %v560_v5  ;;  %v563_v9 = vpop.f32.mrb[2].mxu1 }
 0x229   :  { %v564_v10 = vpop.f32.mrb[3].mxu1 }
 0x22a   :  { %v483_v11 = vadd.f32 %v562_v8, %v527_v6 }
 0x22c   :  { %488 = vst [vmem:[%s794_s5] sm:$0xff] %v483_v11 }
 0x22d   :  { %493 = vsyncpa [#allocation3], 1 }
 0x22e   :  { %494 = vsyncpa [#allocation5], 1 }

</bundles_post_ra>
